<compile_context>
chip_gen: v5e
topology: v5e:2x2
jax: 0.10.0
libtpu: 0.0.40
codegen_flags: <defaults>
</compile_context>

<pallas_src>
import functools

import numpy as np
import jax
import jax.numpy as jnp
from jax.experimental import pallas as pl
from jax.experimental.pallas import tpu as pltpu


# ------------------------------ small helpers --------------------------------
def _round_up(x, m):
    return ((x + m - 1) // m) * m


def _vmem_capacity_bytes():
    """Physical VMEM per TensorCore (128 MiB v5e/v6e, 64 MiB v7x); safe fallback."""
    try:
        info = pltpu.get_tpu_info()
        cap = int(getattr(info, "vmem_capacity_bytes", 0))
        if cap > 0:
            return cap
    except Exception:
        pass
    return 64 * 1024 * 1024


def _pick_batch_chunk(bp):
    """Split the batch into two packing-friendly blocks so the leading 'parallel' grid
    axis of the recurrence can shard across v7x's two TensorCores."""
    half = bp // 2
    if bp >= 32 and half % 16 == 0:
        return half
    return bp


def _pick_time_chunk(T, bc, hp, g6, pre_isz, w_isz, budget, cap=8):
    """Largest Tc (<= cap, <= T) whose double-buffered blocks fit the VMEM budget."""
    fixed = 2 * (hp * 5 * hp * w_isz)          # resident W_hh (double-buffered)
    fixed += 2 * (bc * hp * 4)                 # h/c f32 state scratch
    fixed += 2 * (bc * 4)                      # lengths block
    per_t = 2 * (bc * g6 * pre_isz) + 2 * (bc * hp * 4)   # pre-gate in + h out
    avail = budget - fixed
    tc = avail // per_t if avail > 0 else 1
    return int(max(1, min(cap, T, tc)))


def _pick_row_chunk(inp, g6, x_isz, o_isz, w_isz, budget, cap=512):
    """Row chunk for the input projection, VMEM-budget aware, multiple of 16."""
    fixed = 2 * (inp * g6 * w_isz) + 2 * (g6 * 4)          # resident W_ih + bias
    per_row = 2 * (inp * x_isz) + 2 * (g6 * o_isz)
    avail = budget - fixed
    rows = avail // per_row if avail > 0 else 16
    rows = max(16, min(cap, (rows // 16) * 16))
    return int(rows)


# --------------------------- input-projection kernel --------------------------
def _input_proj_kernel(x_ref, w_ref, b_ref, out_ref):
    # x_ref: (tm, INp)   w_ref: (INp, 6*Hp)   b_ref: (1, 6*Hp) f32   out_ref: (tm, 6*Hp)
    out_ref[...] = (
        jnp.dot(x_ref[...], w_ref[...], preferred_element_type=jnp.float32)
        + b_ref[...]
    ).astype(out_ref.dtype)


def _input_projection(x_tm, w_ih_f, b_f, tile_budget, vmem_limit):
    """pre_gates = x @ W_ih_fused + bias for all timesteps.  x_tm: (Tp, Bp, INp).
    Returns (Tp, Bp, 6*Hp) in the matmul dtype (bf16 by default -> half the HBM/VMEM)."""
    Tp, Bp, INp = x_tm.shape
    G6 = w_ih_f.shape[1]
    out_dtype = w_ih_f.dtype
    x_isz = jnp.dtype(x_tm.dtype).itemsize
    w_isz = jnp.dtype(w_ih_f.dtype).itemsize
    o_isz = jnp.dtype(out_dtype).itemsize

    R = Tp * Bp
    x2d = x_tm.reshape(R, INp)
    tm = _pick_row_chunk(INp, G6, x_isz, o_isz, w_isz, tile_budget)
    if R <= tm:
        tm, R_pad = R, R
    else:
        R_pad = _round_up(R, tm)
        if R_pad != R:
            x2d = jnp.zeros((R_pad, INp), x2d.dtype).at[:R].set(x2d)

    pre2d = pl.pallas_call(
        _input_proj_kernel,
        out_shape=jax.ShapeDtypeStruct((R_pad, G6), out_dtype),
        grid_spec=pltpu.PrefetchScalarGridSpec(
            num_scalar_prefetch=0,
            grid=(R_pad // tm,),
            in_specs=[
                pl.BlockSpec((tm, INp), lambda r: (r, 0)),      # x rows
                pl.BlockSpec((INp, G6), lambda r: (0, 0)),      # fused W_ih (resident)
                pl.BlockSpec((1, G6), lambda r: (0, 0)),        # fused bias (resident)
            ],
            out_specs=pl.BlockSpec((tm, G6), lambda r: (r, 0)),
        ),
        compiler_params=pltpu.CompilerParams(
            dimension_semantics=("parallel",),                   # shards across TCs (v7x)
            vmem_limit_bytes=vmem_limit),
    )(x2d, w_ih_f, b_f)
    return pre2d[:R].reshape(Tp, Bp, G6)


# ----------------------------- recurrent kernel -------------------------------
def _hlstm_recurrent_kernel(pre_ref, whh_ref, len_ref, h_out_ref, h_sc, c_sc,
                            *, drop_scale, unroll):
    # pre_ref: (Tc, Bc, 6*Hp)  whh_ref: (Hp, 5*Hp)  len_ref: (Bc, 1) int32
    # h_out_ref: (Tc, Bc, Hp) f32   h_sc/c_sc: (Bc, Hp) f32 scratch (carry across tt)
    Tc = pre_ref.shape[0]
    Hp = whh_ref.shape[0]
    t0 = pl.program_id(1) * Tc                                  # global timestep offset

    @pl.when(pl.program_id(1) == 0)                             # fresh sequence block
    def _init():
        h_sc[...] = jnp.zeros_like(h_sc)
        c_sc[...] = jnp.zeros_like(c_sc)

    lens = len_ref[...]                                         # (Bc,1), hoisted out of loop

    def step(tt, carry):
        h_prev = h_sc[...]
        c_prev = c_sc[...]
        pre = pre_ref[tt].astype(jnp.float32)                   # (Bc, 6*Hp)
        gh = jnp.dot(h_prev.astype(whh_ref.dtype), whh_ref[...],
                     preferred_element_type=jnp.float32)        # (Bc, 5*Hp), f32 accumulate
        g = pre[:, :5 * Hp] + gh
        carry_lin = pre[:, 5 * Hp:]                             # linear carry (bias-free)
        sig = jax.nn.sigmoid(g[:, :4 * Hp])                     # one EUP pass: i|f|o|r
        i_g = sig[:, 0 * Hp:1 * Hp]
        f_g = sig[:, 1 * Hp:2 * Hp]
        o_g = sig[:, 2 * Hp:3 * Hp]
        r_g = sig[:, 3 * Hp:4 * Hp]
        cand = jnp.tanh(g[:, 4 * Hp:5 * Hp])
        c_new = f_g * c_prev + i_g * cand
        # r*(o*tanh(c)) + (1-r)*carry  ==  carry + r*(o*tanh(c) - carry)
        h_new = carry_lin + r_g * (o_g * jnp.tanh(c_new) - carry_lin)
        if drop_scale != 1.0:                                   # static eval-mode scale
            h_new = h_new * jnp.float32(drop_scale)
        mask = ((t0 + tt) < lens).astype(jnp.float32)           # (Bc,1) lane-broadcast
        h_new = h_new * mask
        c_new = c_new * mask
        h_sc[...] = h_new                                       # state lives in VMEM scratch
        c_sc[...] = c_new
        h_out_ref[tt] = h_new.astype(h_out_ref.dtype)
        return carry

    jax.lax.fori_loop(0, Tc, step, 0, unroll=unroll)


def _hlstm_recurrence(pre, w_hh_f, lens_p, drop_scale, Tc, Bc, vmem_limit):
    """Serial highway-LSTM recurrence.  pre: (Tp,Bp,6*Hp).  Returns (Tp,Bp,Hp) f32."""
    Tp, Bp, G6 = pre.shape
    Hp = w_hh_f.shape[0]
    # Moderate unroll when the per-step (Bc,Hp) tensors are large (vreg pressure / spills).
    unroll = int(Tc) if Bc * Hp < 32768 else 2
    kernel = functools.partial(_hlstm_recurrent_kernel,
                               drop_scale=float(drop_scale), unroll=unroll)
    return pl.pallas_call(
        kernel,
        out_shape=jax.ShapeDtypeStruct((Tp, Bp, Hp), jnp.float32),
        grid_spec=pltpu.PrefetchScalarGridSpec(
            num_scalar_prefetch=0,
            grid=(Bp // Bc, Tp // Tc),                          # (batch-parallel, time-serial)
            in_specs=[
                pl.BlockSpec((Tc, Bc, G6), lambda bb, tt: (tt, bb, 0)),   # pre-gate chunk
                pl.BlockSpec((Hp, 5 * Hp), lambda bb, tt: (0, 0)),        # fused W_hh resident
                pl.BlockSpec((Bc, 1), lambda bb, tt: (bb, 0)),            # lengths
            ],
            out_specs=pl.BlockSpec((Tc, Bc, Hp), lambda bb, tt: (tt, bb, 0)),
            scratch_shapes=[pltpu.VMEM((Bc, Hp), jnp.float32),            # h state
                            pltpu.VMEM((Bc, Hp), jnp.float32)],           # c state
        ),
        compiler_params=pltpu.CompilerParams(
            dimension_semantics=("parallel", "arbitrary"),
            vmem_limit_bytes=vmem_limit),
    )(pre, w_hh_f, lens_p)


# -------------------------- parameter initialisation --------------------------
def _orthonormal(dim_in, dim_out, rng):
    if dim_in == dim_out:
        M = rng.randn(dim_in, dim_out)
        Q, R = np.linalg.qr(M)
        Q = Q * np.sign(np.diag(R))
        return Q.astype(np.float32)
    M1 = rng.randn(dim_in, dim_in)
    M2 = rng.randn(dim_out, dim_out)
    Q1, R1 = np.linalg.qr(M1)
    Q2, R2 = np.linalg.qr(M2)
    Q1 = Q1 * np.sign(np.diag(R1))
    Q2 = Q2 * np.sign(np.diag(R2))
    n_min = min(dim_in, dim_out)
    return (Q1[:, :n_min] @ Q2[:n_min, :]).astype(np.float32)


def init_highway_lstm_params(input_size, hidden_size, num_layers, seed=0):
    """Natural per-gate layout: W_ih (6,in,H), W_hh (5,H,H), bias (5,1,H)."""
    rng = np.random.RandomState(seed)
    params = []
    for layer in range(num_layers):
        insize = input_size if layer == 0 else hidden_size
        w_ih = np.stack([_orthonormal(insize, hidden_size, rng) for _ in range(6)], 0)
        w_hh = np.stack([_orthonormal(hidden_size, hidden_size, rng) for _ in range(5)], 0)
        b = np.zeros((5, 1, hidden_size), np.float32)
        b[1] = 1.0  # forget-gate bias init to 1 (matches reset_parameters)
        params.append((jnp.asarray(w_ih), jnp.asarray(w_hh), jnp.asarray(b)))
    return params


# ------------------------- fused / padded weight prep --------------------------
def _prepare_fused_weights(w_ih, w_hh, b, in_p, h_p, matmul_dtype):
    """Reorder gates to (i, f, o, r, cand, carry), zero-pad to (in_p, Hp) / (Hp, Hp),
    and concatenate along the output axis into single wide matmul operands."""
    _, n_in, H = w_ih.shape
    order_i = (0, 1, 3, 4, 2, 5)   # natural (i,f,cand,o,r,carry) -> (i,f,o,r,cand,carry)
    order_h = (0, 1, 3, 4, 2)
    wih = jnp.stack([w_ih[k] for k in order_i], 0)                       # (6, n_in, H)
    whh = jnp.stack([w_hh[k] for k in order_h], 0)                       # (5, H, H)
    bb = jnp.stack([b[k] for k in order_h] + [jnp.zeros_like(b[0])], 0)  # (6,1,H); carry bias-free
    wih_p = jnp.zeros((6, in_p, h_p), jnp.float32).at[:, :n_in, :H].set(wih)
    whh_p = jnp.zeros((5, h_p, h_p), jnp.float32).at[:, :H, :H].set(whh)
    b_p = jnp.zeros((6, 1, h_p), jnp.float32).at[:, :, :H].set(bb)
    w_ih_f = jnp.transpose(wih_p, (1, 0, 2)).reshape(in_p, 6 * h_p).astype(matmul_dtype)
    w_hh_f = jnp.transpose(whh_p, (1, 0, 2)).reshape(h_p, 5 * h_p).astype(matmul_dtype)
    b_f = jnp.transpose(b_p, (1, 0, 2)).reshape(1, 6 * h_p)              # bias stays f32
    return w_ih_f, w_hh_f, b_f


def prepare_highway_lstm_weights(params, input_size, hidden_size,
                                 matmul_dtype=jnp.bfloat16):
    """Fuse/reorder/pad/cast all layer weights ONCE (hoisted out of the forward pass)."""
    Hp = _round_up(hidden_size, 128)
    fused = []
    for layer, (w_ih, w_hh, b) in enumerate(params):
        in_p = _round_up(input_size, 128) if layer == 0 else Hp
        fused.append(_prepare_fused_weights(w_ih, w_hh, b, in_p, Hp, matmul_dtype))
    return fused


# ------------------------------ module wrapper --------------------------------
def highway_lstm_forward(x_bf, lengths, fused_params, hidden_size, num_layers,
                         recurrent_dropout_prob=0.0):
    """x_bf: (B, T, input_size) batch-first, lengths: (B,) int32.
    fused_params: output of prepare_highway_lstm_weights.
    Returns ((output(B,T,H), lengths), hidden(num_layers, T, B, H))."""
    B, T, in_size = x_bf.shape
    H = hidden_size
    w_ih0_f, w_hh0_f, _ = fused_params[0]
    INp = w_ih0_f.shape[0]
    Hp = w_hh0_f.shape[0]
    G6 = 6 * Hp
    mm_dtype = w_ih0_f.dtype
    mm_isz = jnp.dtype(mm_dtype).itemsize

    vmem_cap = _vmem_capacity_bytes()
    tile_budget = int(vmem_cap * 0.6)                       # for block sizing
    vmem_limit = int(vmem_cap * 0.85)                       # raise Mosaic scoped limit

    Bp = _round_up(B, 8)                                    # sublane-dense batch
    Bc = _pick_batch_chunk(Bp)
    Tc = _pick_time_chunk(T, Bc, Hp, G6, mm_isz, mm_isz, tile_budget)
    Tp = _round_up(T, Tc)                                   # no exact divisor required

    x = jnp.transpose(x_bf, (1, 0, 2)).astype(jnp.float32)  # (T, B, IN) time-major
    x_pad = jnp.zeros((Tp, Bp, INp), jnp.float32).at[:T, :B, :in_size].set(x)
    lens_p = jnp.zeros((Bp, 1), jnp.int32).at[:B, 0].set(lengths.astype(jnp.int32))
    drop_scale = 1.0 - float(recurrent_dropout_prob)        # eval-mode fill(1-p)

    layer_in = x_pad.astype(mm_dtype)
    hidden_all = []
    for layer in range(num_layers):
        w_ih_f, w_hh_f, b_f = fused_params[layer]
        pre = _input_projection(layer_in, w_ih_f, b_f, tile_budget, vmem_limit)
        h_seq = _hlstm_recurrence(pre, w_hh_f, lens_p, drop_scale, Tc, Bc, vmem_limit)
        hidden_all.append(h_seq[:T, :B, :H])
        # padded columns / batch rows / timesteps of h_seq are exactly zero -> safe input
        layer_in = h_seq.astype(mm_dtype)
    hidden = jnp.stack(hidden_all, 0)                       # (num_layers, T, B, H) ~ hy[:,1:]
    output = jnp.transpose(hidden_all[-1], (1, 0, 2))       # (B, T, H) batch-first
    return (output, lengths), hidden


# --------------------------- pure-JAX reference -------------------------------
def _ref_layer(x, w_ih, w_hh, b, drop, mask):
    T, B, _ = x.shape
    H = w_hh.shape[-1]

    def step(carry, inp):
        h, c = carry
        x_t, m_t = inp
        gi = [x_t @ w_ih[k] for k in range(6)]
        gh = [h @ w_hh[k] for k in range(5)]
        i_g = jax.nn.sigmoid(gi[0] + gh[0] + b[0])
        f_g = jax.nn.sigmoid(gi[1] + gh[1] + b[1])
        cand = jnp.tanh(gi[2] + gh[2] + b[2])
        o_g = jax.nn.sigmoid(gi[3] + gh[3] + b[3])
        r_g = jax.nn.sigmoid(gi[4] + gh[4] + b[4])
        c_new = f_g * c + i_g * cand
        h_new = o_g * jnp.tanh(c_new)
        h_new = r_g * h_new + (1.0 - r_g) * gi[5]
        h_new = h_new * drop * m_t
        c_new = c_new * m_t
        return (h_new, c_new), h_new

    init = (jnp.zeros((B, H), jnp.float32), jnp.zeros((B, H), jnp.float32))
    _, hs = jax.lax.scan(step, init, (x, mask))
    return hs


def _ref_forward(x_bf, lengths, params, hidden_size, num_layers, p=0.0):
    B, T, _ = x_bf.shape
    x = jnp.transpose(x_bf, (1, 0, 2)).astype(jnp.float32)
    mask = (jnp.arange(T)[:, None] < lengths[None, :]).astype(jnp.float32)[..., None]
    drop = jnp.full((B, hidden_size), 1.0 - p, jnp.float32)
    layer_in = x
    hs = []
    for layer in range(num_layers):
        w_ih, w_hh, b = params[layer]
        h = _ref_layer(layer_in, w_ih, w_hh, b, drop, mask)
        hs.append(h)
        layer_in = h
    return jnp.transpose(hs[-1], (1, 0, 2)), jnp.stack(hs, 0)


# ----------------------------------- main --------------------------------------
if __name__ == "__main__":
    B, T, INPUT, HIDDEN, LAYERS = 2, 8, 16, 32, 2

    key = jax.random.PRNGKey(0)
    x = jax.random.normal(key, (B, T, INPUT), dtype=jnp.float32)   # batch-first module input
    lengths = jnp.array([T, 5], dtype=jnp.int32)                   # sorted desc (packed-seq style)

    params = init_highway_lstm_params(INPUT, HIDDEN, LAYERS, seed=0)
    ref_out, ref_hidden = _ref_forward(x, lengths, params, HIDDEN, LAYERS)

    # Exact-precision path (f32 matmul operands) — tight verification of kernel semantics.
    fused_f32 = prepare_highway_lstm_weights(params, INPUT, HIDDEN,
                                             matmul_dtype=jnp.float32)
    (out_f32, _), hid_f32 = highway_lstm_forward(x, lengths, fused_f32, HIDDEN, LAYERS)
    out_f32 = jax.block_until_ready(out_f32)
    np.testing.assert_allclose(np.asarray(out_f32), np.asarray(ref_out),
                               atol=1e-4, rtol=1e-4)
    np.testing.assert_allclose(np.asarray(hid_f32), np.asarray(ref_hidden),
                               atol=1e-4, rtol=1e-4)

    # Default production path: bf16 MXU operands + bf16 pre-gate intermediate,
    # f32 accumulation/state — loose tolerance vs the f32 reference.
    fused_bf16 = prepare_highway_lstm_weights(params, INPUT, HIDDEN)   # bf16 default
    (output, out_lengths), hidden = highway_lstm_forward(x, lengths, fused_bf16,
                                                         HIDDEN, LAYERS)
    output = jax.block_until_ready(output)
    hidden = jax.block_until_ready(hidden)

    assert output.shape == (B, T, HIDDEN)
    assert hidden.shape == (LAYERS, T, B, HIDDEN)
    np.testing.assert_allclose(np.asarray(output), np.asarray(ref_out),
                               atol=1e-1, rtol=1e-1)
    np.testing.assert_allclose(np.asarray(hidden), np.asarray(ref_hidden),
                               atol=1e-1, rtol=1e-1)

    print("KERNEL_OK")
</pallas_src>

<mosaic_0001>
module attributes {stable_mosaic.version = 11 : i64} {
  func.func @_input_proj_kernel(%arg0: i32, %arg1: memref<64x128xf32, #tpu.memory_space<vmem>>, %arg2: memref<128x768xf32, #tpu.memory_space<vmem>>, %arg3: memref<1x768xf32, #tpu.memory_space<vmem>>, %arg4: memref<64x768xf32, #tpu.memory_space<vmem>>) attributes {dimension_semantics = [#tpu.dimension_semantics<parallel>], iteration_bounds = array<i64: 1>, scalar_prefetch = 0 : i64, scratch_operands = 0 : i64, tpu.core_type = #tpu.core_type<tc>, window_params = [{transform_indices = @transform_0, window_bounds = array<i64: 64, 128>}, {pipeline_mode = #tpu.pipeline_mode<synchronous>, transform_indices = @transform_1, window_bounds = array<i64: 128, 768>}, {pipeline_mode = #tpu.pipeline_mode<synchronous>, transform_indices = @transform_2, window_bounds = array<i64: 1, 768>}, {transform_indices = @transform_3, window_bounds = array<i64: 64, 768>}]} {
    %c0 = arith.constant 0 : index
    %c0_0 = arith.constant 0 : index
    %0 = vector.load %arg1[%c0, %c0_0] : memref<64x128xf32, #tpu.memory_space<vmem>>, vector<64x128xf32>
    %c0_1 = arith.constant 0 : index
    %c0_2 = arith.constant 0 : index
    %1 = vector.load %arg2[%c0_1, %c0_2] : memref<128x768xf32, #tpu.memory_space<vmem>>, vector<128x768xf32>
    %cst = arith.constant dense<0.000000e+00> : vector<64x768xf32>
    %2 = tpu.matmul %0, %1, %cst {dimension_numbers = #tpu.dot_dimension_numbers<[1], [0], [0], [1], [0, 0, 1, 1], [], []>} : vector<64x128xf32>, vector<128x768xf32>, vector<64x768xf32> -> vector<64x768xf32>
    %c0_3 = arith.constant 0 : index
    %c0_4 = arith.constant 0 : index
    %3 = vector.load %arg3[%c0_3, %c0_4] : memref<1x768xf32, #tpu.memory_space<vmem>>, vector<1x768xf32>
    %4 = vector.broadcast %3 : vector<1x768xf32> to vector<64x768xf32>
    %5 = arith.addf %2, %4 : vector<64x768xf32>
    %c0_5 = arith.constant 0 : index
    %c0_6 = arith.constant 0 : index
    %6 = vector.load %arg4[%c0_5, %c0_6] : memref<64x768xf32, #tpu.memory_space<vmem>>, vector<64x768xf32>
    tpu.vector_store %arg4[%c0_5, %c0_6], %5 {strides = array<i32>} : memref<64x768xf32, #tpu.memory_space<vmem>>, vector<64x768xf32>,
    return
  }
  func.func @transform_0(%arg0: i32) -> (i32, i32) {
    %c0_i32 = arith.constant 0 : i32
    %c0_i32_0 = arith.constant 0 : i32
    return %arg0, %c0_i32 : i32, i32
  }
  func.func @transform_1(%arg0: i32) -> (i32, i32) {
    %c0_i32 = arith.constant 0 : i32
    %c0_i32_0 = arith.constant 0 : i32
    %c0_i32_1 = arith.constant 0 : i32
    return %c0_i32, %c0_i32_0 : i32, i32
  }
  func.func @transform_2(%arg0: i32) -> (i32, i32) {
    %c0_i32 = arith.constant 0 : i32
    %c0_i32_0 = arith.constant 0 : i32
    %c0_i32_1 = arith.constant 0 : i32
    return %c0_i32, %c0_i32_0 : i32, i32
  }
  func.func @transform_3(%arg0: i32) -> (i32, i32) {
    %c0_i32 = arith.constant 0 : i32
    %c0_i32_0 = arith.constant 0 : i32
    return %arg0, %c0_i32 : i32, i32
  }
}

</mosaic_0001>

<bundles_post_ra>
// kernel: tpu_custom_call.1
= control target key start
LH: loop header
LB: loop body
LE: loop exit
PB: predicated region body
PF: predicated region fallthrough
CT: control target
= control target key end

     0   :  { %8 = vsyncpa [#allocation3], 0  ;;  %s776_s0 = inlined_call_operand.hbm [shape: f32[64,128], index: 0, kind: input, shape index: {}]   ;;  %s777_s1 = inlined_call_operand.hbm [shape: f32[128,768], index: 1, kind: input, shape index: {}]   ;;  %s778_s2 = inlined_call_operand.hbm [shape: f32[1,768], index: 2, kind: input, shape index: {}]   ;;  %s779_s3 = inlined_call_operand.hbm [shape: f32[64,768], index: 3, kind: output, shape index: {}]  }
   0x1   :  { %9 = vsyncpa [#allocation6], 0  ;;  %s28_s14 = sshll.u32 %s777_s1, 4  ;;  %s29_s14 = int_to_ptr.hbm [resolvable:$true] %s28_s14 }
   0x2   :  { %10 = vsyncpa [#allocation4], 0  ;;  %s634_s15 = smov [#allocation5]   ;;  %s15_s19 = sshll.u32 %s776_s0, 4  ;;  %s16_s19 = int_to_ptr.hbm [resolvable:$true] %s15_s19 }
   0x3   :  { %s30_s16 = sshll.u32 %s634_s15, 4  ;;  %s635_s20 = smov 768   ;;  %s31_s16 = int_to_ptr.vmem [resolvable:$true] %s30_s16 }
   0x4   :  { %s636_s21 = smov 48   ;;  %s637_s22 = smov [#allocation2]  }
   0x5   :  { %36 = dma.hbm_to_vmem [thread:$0]  %s29_s14, 12288, %s31_s16, [#allocation6], %s635_s20, %s635_s20, %s636_s21  }
   0x6   :  { %s17_s23 = sshll.u32 %s637_s22, 4  ;;  %s638_s1 = smov 128   ;;  %s18_s23 = int_to_ptr.vmem [resolvable:$true] %s17_s23 }
   0x7   :  { %s639_s24 = smov 8   ;;  %s42_s27 = sshll.u32 %s778_s2, 4  ;;  %s43_s27 = int_to_ptr.hbm [resolvable:$true] %s42_s27 }
   0x8   :  { %23 = dma.hbm_to_vmem [thread:$0]  %s16_s19, 1024, %s18_s23, [#allocation3], %s638_s1, %s638_s1, %s639_s24  }
   0x9   :  { %s640_s28 = smov [#allocation7]  }
   0xa   :  { %s44_s0 = sshll.u32 %s640_s28, 4  ;;  %s45_s0 = int_to_ptr.vmem [resolvable:$true] %s44_s0 }
   0xb   :  { %47 = dma.hbm_to_vmem [thread:$0]  %s43_s27, 96, %s45_s0, [#allocation6]  }
   0xc   :  { %628 = dma.done.wait [#allocation3], 1024  }
   0xd   :  { %629 = vsyncadd [#allocation3], 4294966272 }
   0xe   :  { %630 = dma.done.wait [#allocation6], 12384  }
   0xf   :  { %631 = vsyncadd [#allocation6], 4294954912  ;;  %v158_v0 = vld [vmem:[#allocation5 + $0x2d0] sm:$0xff]  ;;  %v159_v1 = vld [vmem:[#allocation5 + $0x2d8] sm:$0xff]  ;;  %s641_s2 = smov [#allocation8]   ;;  %s478_s5 = sshll.u32 %s779_s3, 4  ;;  %s479_s5 = int_to_ptr.hbm [resolvable:$true] %s478_s5 }
  0x10   :  { %v152_v2 = vld [vmem:[#allocation5 + $0x2a0] sm:$0xff]  ;;  %492 = vmatpush.msra.mxu2 %v158_v0  ;;  %508 = vmatpush.msra.mxu3 %v159_v1  ;;  %v153_v3 = vld [vmem:[#allocation5 + $0x2a8] sm:$0xff]  ;;  %v146_v4 = vld [vmem:[#allocation5 + $0x270] sm:$0xff]  ;;  %s476_s29 = sshll.u32 %s641_s2, 4  ;;  %s477_s29 = int_to_ptr.vmem [resolvable:$true] %s476_s29 }
  0x11   :  { %v147_v5 = vld [vmem:[#allocation5 + $0x278] sm:$0xff]  ;;  %178 = vmatpush.msra.mxu0 %v158_v0  ;;  %219 = vmatpush.msra.mxu1 %v159_v1  ;;  %v140_v6 = vld [vmem:[#allocation5 + $0x240] sm:$0xff]  ;;  %v141_v7 = vld [vmem:[#allocation5 + $0x248] sm:$0xff] }
  0x12   :  { %493 = vmatpush.msra.mxu2 %v152_v2  ;;  %509 = vmatpush.msra.mxu3 %v153_v3  ;;  %v134_v8 = vld [vmem:[#allocation5 + $0x210] sm:$0xff]  ;;  %v135_v9 = vld [vmem:[#allocation5 + $0x218] sm:$0xff]  ;;  %v128_v10 = vld [vmem:[#allocation5 + $0x1e0] sm:$0xff] }
  0x13   :  { %179 = vmatpush.msra.mxu0 %v152_v2  ;;  %220 = vmatpush.msra.mxu1 %v153_v3  ;;  %v129_v11 = vld [vmem:[#allocation5 + $0x1e8] sm:$0xff]  ;;  %v122_v12 = vld [vmem:[#allocation5 + $0x1b0] sm:$0xff]  ;;  %v123_v13 = vld [vmem:[#allocation5 + $0x1b8] sm:$0xff] }
  0x14   :  { %494 = vmatpush.msra.mxu2 %v146_v4  ;;  %510 = vmatpush.msra.mxu3 %v147_v5  ;;  %v116_v14 = vld [vmem:[#allocation5 + $0x180] sm:$0xff]  ;;  %v117_v15 = vld [vmem:[#allocation5 + $0x188] sm:$0xff]  ;;  %v110_v16 = vld [vmem:[#allocation5 + $0x150] sm:$0xff] }
  0x15   :  { %180 = vmatpush.msra.mxu0 %v146_v4  ;;  %221 = vmatpush.msra.mxu1 %v147_v5  ;;  %v111_v17 = vld [vmem:[#allocation5 + $0x158] sm:$0xff]  ;;  %v104_v18 = vld [vmem:[#allocation5 + $0x120] sm:$0xff]  ;;  %v105_v19 = vld [vmem:[#allocation5 + $0x128] sm:$0xff] }
  0x16   :  { %495 = vmatpush.msra.mxu2 %v140_v6  ;;  %511 = vmatpush.msra.mxu3 %v141_v7  ;;  %v98_v20 = vld [vmem:[#allocation5 + $0xf0] sm:$0xff]  ;;  %v99_v21 = vld [vmem:[#allocation5 + $0xf8] sm:$0xff]  ;;  %v92_v22 = vld [vmem:[#allocation5 + $0xc0] sm:$0xff] }
  0x17   :  { %181 = vmatpush.msra.mxu0 %v140_v6  ;;  %222 = vmatpush.msra.mxu1 %v141_v7  ;;  %v93_v23 = vld [vmem:[#allocation5 + $0xc8] sm:$0xff]  ;;  %v86_v24 = vld [vmem:[#allocation5 + $0x90] sm:$0xff]  ;;  %v87_v25 = vld [vmem:[#allocation5 + $0x98] sm:$0xff] }
  0x18   :  { %496 = vmatpush.msra.mxu2 %v134_v8  ;;  %512 = vmatpush.msra.mxu3 %v135_v9  ;;  %v80_v26 = vld [vmem:[#allocation5 + $0x60] sm:$0xff]  ;;  %v81_v27 = vld [vmem:[#allocation5 + $0x68] sm:$0xff]  ;;  %v74_v28 = vld [vmem:[#allocation5 + $0x30] sm:$0xff] }
  0x19   :  { %182 = vmatpush.msra.mxu0 %v134_v8  ;;  %223 = vmatpush.msra.mxu1 %v135_v9  ;;  %v75_v29 = vld [vmem:[#allocation5 + $0x38] sm:$0xff]  ;;  %v68_v30 = vld [vmem:[#allocation5] sm:$0xff]  ;;  %v69_v31 = vld [vmem:[#allocation5 + $0x8] sm:$0xff] }
  0x1a   :  { %497 = vmatpush.msra.mxu2 %v128_v10  ;;  %513 = vmatpush.msra.mxu3 %v129_v11  ;;  %v674_v32 = vld [vmem:[#allocation2 + $0x20] sm:$0xff]  ;;  %v161_v34 = vld [vmem:[#allocation5 + $0x2e8] sm:$0xff]  ;;  %v154_v35 = vld [vmem:[#allocation5 + $0x2b0] sm:$0xff] }
  0x1b   :  { %183 = vmatpush.msra.mxu0 %v128_v10  ;;  %224 = vmatpush.msra.mxu1 %v129_v11  ;;  %v160_v33 = vld [vmem:[#allocation5 + $0x2e0] sm:$0xff]  ;;  %v155_v36 = vld [vmem:[#allocation5 + $0x2b8] sm:$0xff]  ;;  %v149_v39 = vld [vmem:[#allocation5 + $0x288] sm:$0xff] }
  0x1c   :  { %498 = vmatpush.msra.mxu2 %v122_v12  ;;  %514 = vmatpush.msra.mxu3 %v123_v13  ;;  %v678_v37 = vld [vmem:[#allocation2] sm:$0xff]  ;;  %v162_v40 = vld [vmem:[#allocation5 + $0x2f0] sm:$0xff]  ;;  %v163_v41 = vld [vmem:[#allocation5 + $0x2f8] sm:$0xff] }
  0x1d   :  { %184 = vmatpush.msra.mxu0 %v122_v12  ;;  %225 = vmatpush.msra.mxu1 %v123_v13  ;;  %v148_v38 = vld [vmem:[#allocation5 + $0x280] sm:$0xff]  ;;  %v142_v42 = vld [vmem:[#allocation5 + $0x250] sm:$0xff]  ;;  %v143_v43 = vld [vmem:[#allocation5 + $0x258] sm:$0xff] }
  0x1e   :  { %499 = vmatpush.msra.mxu2 %v116_v14  ;;  %515 = vmatpush.msra.mxu3 %v117_v15  ;;  %v682_v44 = vld [vmem:[#allocation2 + $0x28] sm:$0xff]  ;;  %v136_v45 = vld [vmem:[#allocation5 + $0x220] sm:$0xff]  ;;  %v130_v49 = vld [vmem:[#allocation5 + $0x1f0] sm:$0xff] }
  0x1f   :  { %185 = vmatpush.msra.mxu0 %v116_v14  ;;  %226 = vmatpush.msra.mxu1 %v117_v15  ;;  %v137_v46 = vld [vmem:[#allocation5 + $0x228] sm:$0xff]  ;;  %v156_v47 = vld [vmem:[#allocation5 + $0x2c0] sm:$0xff]  ;;  %v131_v50 = vld [vmem:[#allocation5 + $0x1f8] sm:$0xff] }
  0x20   :  { %500 = vmatpush.msra.mxu2 %v110_v16  ;;  %516 = vmatpush.msra.mxu3 %v111_v17  ;;  %v157_v48 = vld [vmem:[#allocation5 + $0x2c8] sm:$0xff]  ;;  %v150_v51 = vld [vmem:[#allocation5 + $0x290] sm:$0xff]  ;;  %v151_v52 = vld [vmem:[#allocation5 + $0x298] sm:$0xff] }
  0x21   :  { %186 = vmatpush.msra.mxu0 %v110_v16  ;;  %227 = vmatpush.msra.mxu1 %v111_v17  ;;  %v124_v53 = vld [vmem:[#allocation5 + $0x1c0] sm:$0xff]  ;;  %v125_v54 = vld [vmem:[#allocation5 + $0x1c8] sm:$0xff]  ;;  %v118_v58 = vld [vmem:[#allocation5 + $0x190] sm:$0xff] }
  0x22   :  { %501 = vmatpush.msra.mxu2 %v104_v18  ;;  %517 = vmatpush.msra.mxu3 %v105_v19  ;;  %v144_v55 = vld [vmem:[#allocation5 + $0x260] sm:$0xff]  ;;  %v145_v56 = vld [vmem:[#allocation5 + $0x268] sm:$0xff]  ;;  %v119_v59 = vld [vmem:[#allocation5 + $0x198] sm:$0xff] }
  0x23   :  { %187 = vmatpush.msra.mxu0 %v104_v18  ;;  %228 = vmatpush.msra.mxu1 %v105_v19  ;;  %v686_v57 = vld [vmem:[#allocation2 + $0x8] sm:$0xff]  ;;  %v138_v60 = vld [vmem:[#allocation5 + $0x230] sm:$0xff]  ;;  %v139_v61 = vld [vmem:[#allocation5 + $0x238] sm:$0xff] }
  0x24   :  { %502 = vmatpush.msra.mxu2 %v98_v20  ;;  %518 = vmatpush.msra.mxu3 %v99_v21  ;;  %v690_v62 = vld [vmem:[#allocation2 + $0x30] sm:$0xff]  ;;  %v112_v63 = vld [vmem:[#allocation5 + $0x160] sm:$0xff]  ;;  %v113_v0 = vld [vmem:[#allocation5 + $0x168] sm:$0xff] }
  0x25   :  { %188 = vmatpush.msra.mxu0 %v98_v20  ;;  %229 = vmatpush.msra.mxu1 %v99_v21  ;;  %v132_v1 = vld [vmem:[#allocation5 + $0x200] sm:$0xff]  ;;  %v133_v2 = vld [vmem:[#allocation5 + $0x208] sm:$0xff]  ;;  %v106_v3 = vld [vmem:[#allocation5 + $0x130] sm:$0xff] }
  0x26   :  { %503 = vmatpush.msra.mxu2 %v92_v22  ;;  %519 = vmatpush.msra.mxu3 %v93_v23  ;;  %v107_v4 = vld [vmem:[#allocation5 + $0x138] sm:$0xff]  ;;  %v126_v5 = vld [vmem:[#allocation5 + $0x1d0] sm:$0xff]  ;;  %v100_v7 = vld [vmem:[#allocation5 + $0x100] sm:$0xff] }
  0x27   :  { %189 = vmatpush.msra.mxu0 %v92_v22  ;;  %230 = vmatpush.msra.mxu1 %v93_v23  ;;  %v127_v6 = vld [vmem:[#allocation5 + $0x1d8] sm:$0xff]  ;;  %v101_v8 = vld [vmem:[#allocation5 + $0x108] sm:$0xff]  ;;  %v120_v9 = vld [vmem:[#allocation5 + $0x1a0] sm:$0xff] }
  0x28   :  { %504 = vmatpush.msra.mxu2 %v86_v24  ;;  %520 = vmatpush.msra.mxu3 %v87_v25  ;;  %v121_v10 = vld [vmem:[#allocation5 + $0x1a8] sm:$0xff]  ;;  %v694_v11 = vld [vmem:[#allocation2 + $0x10] sm:$0xff]  ;;  %v95_v13 = vld [vmem:[#allocation5 + $0xd8] sm:$0xff] }
  0x29   :  { %190 = vmatpush.msra.mxu0 %v86_v24  ;;  %231 = vmatpush.msra.mxu1 %v87_v25  ;;  %v94_v12 = vld [vmem:[#allocation5 + $0xd0] sm:$0xff]  ;;  %v115_v15 = vld [vmem:[#allocation5 + $0x178] sm:$0xff]  ;;  %v88_v17 = vld [vmem:[#allocation5 + $0xa0] sm:$0xff] }
  0x2a   :  { %505 = vmatpush.msra.mxu2 %v80_v26  ;;  %521 = vmatpush.msra.mxu3 %v81_v27  ;;  %v114_v14 = vld [vmem:[#allocation5 + $0x170] sm:$0xff]  ;;  %v698_v16 = vld [vmem:[#allocation2 + $0x38] sm:$0xff]  ;;  %v89_v18 = vld [vmem:[#allocation5 + $0xa8] sm:$0xff] }
  0x2b   :  { %191 = vmatpush.msra.mxu0 %v80_v26  ;;  %232 = vmatpush.msra.mxu1 %v81_v27  ;;  %v108_v19 = vld [vmem:[#allocation5 + $0x140] sm:$0xff]  ;;  %v109_v20 = vld [vmem:[#allocation5 + $0x148] sm:$0xff]  ;;  %v82_v21 = vld [vmem:[#allocation5 + $0x70] sm:$0xff] }
  0x2c   :  { %506 = vmatpush.msra.mxu2 %v74_v28  ;;  %522 = vmatpush.msra.mxu3 %v75_v29  ;;  %v83_v22 = vld [vmem:[#allocation5 + $0x78] sm:$0xff]  ;;  %v102_v23 = vld [vmem:[#allocation5 + $0x110] sm:$0xff]  ;;  %v76_v25 = vld [vmem:[#allocation5 + $0x40] sm:$0xff] }
  0x2d   :  { %192 = vmatpush.msra.mxu0 %v74_v28  ;;  %233 = vmatpush.msra.mxu1 %v75_v29  ;;  %v103_v24 = vld [vmem:[#allocation5 + $0x118] sm:$0xff]  ;;  %v77_v26 = vld [vmem:[#allocation5 + $0x48] sm:$0xff]  ;;  %v96_v27 = vld [vmem:[#allocation5 + $0xe0] sm:$0xff] }
  0x2e   :  { %507 = vmatpush.msra.mxu2 %v68_v30  ;;  %523 = vmatpush.msra.mxu3 %v69_v31  ;;  %v97_v28 = vld [vmem:[#allocation5 + $0xe8] sm:$0xff]  ;;  %v63_v29 = vld [vmem:[#allocation2 + $0x18] sm:$0xff] }
  0x2f   :  { %206 = vmatmul.f32.vlgmr.msra.gmra.mxu2 %v674_v32  ;;  %247 = vmatmul.f32.vlgmr.msra.gmra.mxu3 %v674_v32 }
  0x30   :  { %260 = vmatpush.msrb.mxu2 %v160_v33  ;;  %301 = vmatpush.msrb.mxu3 %v161_v34  ;;  %v90_v33 = vld [vmem:[#allocation5 + $0xb0] sm:$0xff]  ;;  %v91_v34 = vld [vmem:[#allocation5 + $0xb8] sm:$0xff] }
  0x31   :  { %193 = vmatpush.msra.mxu0 %v68_v30  ;;  %234 = vmatpush.msra.mxu1 %v69_v31  ;;  %v70_v30 = vld [vmem:[#allocation5 + $0x10] sm:$0xff]  ;;  %v71_v31 = vld [vmem:[#allocation5 + $0x18] sm:$0xff] }
  0x32   :  { %261 = vmatpush.msrb.mxu2 %v154_v35  ;;  %302 = vmatpush.msrb.mxu3 %v155_v36  ;;  %v84_v35 = vld [vmem:[#allocation5 + $0x80] sm:$0xff]  ;;  %v85_v36 = vld [vmem:[#allocation5 + $0x88] sm:$0xff] }
  0x33   :  { %194 = vmatmul.f32.vlgmr.msra.gmra.mxu0 %v678_v37  ;;  %235 = vmatmul.f32.vlgmr.msra.gmra.mxu1 %v678_v37 }
  0x34   :  { %262 = vmatpush.msrb.mxu2 %v148_v38  ;;  %303 = vmatpush.msrb.mxu3 %v149_v39  ;;  %v78_v38 = vld [vmem:[#allocation5 + $0x50] sm:$0xff]  ;;  %v79_v39 = vld [vmem:[#allocation5 + $0x58] sm:$0xff] }
  0x35   :  { %342 = vmatpush.msrb.mxu0 %v162_v40  ;;  %383 = vmatpush.msrb.mxu1 %v163_v41  ;;  %v72_v40 = vld [vmem:[#allocation5 + $0x20] sm:$0xff]  ;;  %v73_v41 = vld [vmem:[#allocation5 + $0x28] sm:$0xff] }
  0x36   :  { %263 = vmatpush.msrb.mxu2 %v142_v42  ;;  %304 = vmatpush.msrb.mxu3 %v143_v43 }
  0x37   :  { %209 = vmatmul.f32.gmra.mxu2 %v682_v44  ;;  %250 = vmatmul.f32.gmra.mxu3 %v682_v44 }
  0x38   :  { %264 = vmatpush.msrb.mxu2 %v136_v45  ;;  %305 = vmatpush.msrb.mxu3 %v137_v46 }
  0x39   :  { %343 = vmatpush.msrb.mxu0 %v156_v47  ;;  %384 = vmatpush.msrb.mxu1 %v157_v48 }
  0x3a   :  { %265 = vmatpush.msrb.mxu2 %v130_v49  ;;  %306 = vmatpush.msrb.mxu3 %v131_v50 }
  0x3b   :  { %344 = vmatpush.msrb.mxu0 %v150_v51  ;;  %385 = vmatpush.msrb.mxu1 %v151_v52 }
  0x3c   :  { %266 = vmatpush.msrb.mxu2 %v124_v53  ;;  %307 = vmatpush.msrb.mxu3 %v125_v54 }
  0x3d   :  { %345 = vmatpush.msrb.mxu0 %v144_v55  ;;  %386 = vmatpush.msrb.mxu1 %v145_v56 }
  0x3e   :  { %197 = vmatmul.f32.gmra.mxu0 %v686_v57  ;;  %238 = vmatmul.f32.gmra.mxu1 %v686_v57 }
  0x3f   :  { %267 = vmatpush.msrb.mxu2 %v118_v58  ;;  %308 = vmatpush.msrb.mxu3 %v119_v59 }
  0x40   :  { %346 = vmatpush.msrb.mxu0 %v138_v60  ;;  %387 = vmatpush.msrb.mxu1 %v139_v61 }
  0x41   :  { %212 = vmatmul.f32.gmra.mxu2 %v690_v62  ;;  %253 = vmatmul.f32.gmra.mxu3 %v690_v62 }
  0x42   :  { %268 = vmatpush.msrb.mxu2 %v112_v63  ;;  %309 = vmatpush.msrb.mxu3 %v113_v0 }
  0x43   :  { %347 = vmatpush.msrb.mxu0 %v132_v1  ;;  %388 = vmatpush.msrb.mxu1 %v133_v2 }
  0x44   :  { %269 = vmatpush.msrb.mxu2 %v106_v3  ;;  %310 = vmatpush.msrb.mxu3 %v107_v4 }
  0x45   :  { %348 = vmatpush.msrb.mxu0 %v126_v5  ;;  %389 = vmatpush.msrb.mxu1 %v127_v6 }
  0x46   :  { %270 = vmatpush.msrb.mxu2 %v100_v7  ;;  %311 = vmatpush.msrb.mxu3 %v101_v8 }
  0x47   :  { %349 = vmatpush.msrb.mxu0 %v120_v9  ;;  %390 = vmatpush.msrb.mxu1 %v121_v10 }
  0x48   :  { %200 = vmatmul.f32.gmra.mxu0 %v694_v11  ;;  %241 = vmatmul.f32.gmra.mxu1 %v694_v11 }
  0x49   :  { %271 = vmatpush.msrb.mxu2 %v94_v12  ;;  %312 = vmatpush.msrb.mxu3 %v95_v13 }
  0x4a   :  { %350 = vmatpush.msrb.mxu0 %v114_v14  ;;  %391 = vmatpush.msrb.mxu1 %v115_v15 }
  0x4b   :  { %215 = vmatmul.f32.gmra.mxu2 %v698_v16  ;;  %256 = vmatmul.f32.gmra.mxu3 %v698_v16 }
  0x4c   :  { %272 = vmatpush.msrb.mxu2 %v88_v17  ;;  %313 = vmatpush.msrb.mxu3 %v89_v18 }
  0x4d   :  { %351 = vmatpush.msrb.mxu0 %v108_v19  ;;  %392 = vmatpush.msrb.mxu1 %v109_v20 }
  0x4e   :  { %273 = vmatpush.msrb.mxu2 %v82_v21  ;;  %314 = vmatpush.msrb.mxu3 %v83_v22 }
  0x4f   :  { %352 = vmatpush.msrb.mxu0 %v102_v23  ;;  %393 = vmatpush.msrb.mxu1 %v103_v24 }
  0x50   :  { %274 = vmatpush.msrb.mxu2 %v76_v25  ;;  %315 = vmatpush.msrb.mxu3 %v77_v26 }
  0x51   :  { %353 = vmatpush.msrb.mxu0 %v96_v27  ;;  %394 = vmatpush.msrb.mxu1 %v97_v28 }
  0x52   :  { %203 = vmatmul.f32.gmra.mxu0 %v63_v29  ;;  %244 = vmatmul.f32.gmra.mxu1 %v63_v29 }
  0x53   :  { %275 = vmatpush.msrb.mxu2 %v70_v30  ;;  %316 = vmatpush.msrb.mxu3 %v71_v31 }
  0x54   :  { %354 = vmatpush.msrb.mxu0 %v90_v33  ;;  %395 = vmatpush.msrb.mxu1 %v91_v34 }
  0x55   :  { %276 = vmatmul.f32.vlgmr.msrb.gmra.mxu2 %v678_v37  ;;  %317 = vmatmul.f32.vlgmr.msrb.gmra.mxu3 %v678_v37 }
  0x56   :  { %355 = vmatpush.msrb.mxu0 %v84_v35  ;;  %396 = vmatpush.msrb.mxu1 %v85_v36 }
  0x58   :  { %356 = vmatpush.msrb.mxu0 %v78_v38  ;;  %397 = vmatpush.msrb.mxu1 %v79_v39 }
  0x5a   :  { %357 = vmatpush.msrb.mxu0 %v72_v40  ;;  %398 = vmatpush.msrb.mxu1 %v73_v41 }
  0x5b   :  { %358 = vmatmul.f32.vlgmr.msrb.gmra.mxu0 %v678_v37  ;;  %399 = vmatmul.f32.vlgmr.msrb.gmra.mxu1 %v678_v37 }
  0x5d   :  { %279 = vmatmul.f32.gmra.mxu2 %v686_v57  ;;  %320 = vmatmul.f32.gmra.mxu3 %v686_v57 }
  0x63   :  { %361 = vmatmul.f32.gmra.mxu0 %v686_v57  ;;  %402 = vmatmul.f32.gmra.mxu1 %v686_v57 }
  0x65   :  { %282 = vmatmul.f32.gmra.mxu2 %v694_v11  ;;  %323 = vmatmul.f32.gmra.mxu3 %v694_v11 }
  0x6b   :  { %364 = vmatmul.f32.gmra.mxu0 %v694_v11  ;;  %405 = vmatmul.f32.gmra.mxu1 %v694_v11 }
  0x6d   :  { %285 = vmatmul.f32.gmra.mxu2 %v63_v29  ;;  %326 = vmatmul.f32.gmra.mxu3 %v63_v29 }
  0x73   :  { %367 = vmatmul.f32.gmra.mxu0 %v63_v29  ;;  %408 = vmatmul.f32.gmra.mxu1 %v63_v29 }
  0x75   :  { %288 = vmatmul.f32.gmra.mxu2 %v674_v32  ;;  %329 = vmatmul.f32.gmra.mxu3 %v674_v32 }
  0x7b   :  { %370 = vmatmul.f32.gmra.mxu0 %v674_v32  ;;  %411 = vmatmul.f32.gmra.mxu1 %v674_v32  ;;  %v164_v32 = vld [vmem:[#allocation7] sm:$0x3f] }
  0x7c   :  { %v166_v37 = vperm.slane %v164_v32, 0  ;;  %v167_v42 = vperm.slane %v164_v32, 1  ;;  %v730_v11 = vperm.slane %v164_v32, 2  ;;  %v732_v12 = vperm.slane %v164_v32, 3 }
  0x7d   :  { %291 = vmatmul.f32.gmra.mxu2 %v682_v44  ;;  %332 = vmatmul.f32.gmra.mxu3 %v682_v44  ;;  %v734_v13 = vperm.slane %v164_v32, 4  ;;  %v736_v14 = vperm.slane %v164_v32, 5 }
  0x83   :  { %373 = vmatmul.f32.gmra.mxu0 %v682_v44  ;;  %414 = vmatmul.f32.gmra.mxu1 %v682_v44 }
  0x85   :  { %294 = vmatmul.f32.gmra.mxu2 %v690_v62  ;;  %335 = vmatmul.f32.gmra.mxu3 %v690_v62 }
  0x8b   :  { %376 = vmatmul.f32.gmra.mxu0 %v690_v62  ;;  %417 = vmatmul.f32.gmra.mxu1 %v690_v62 }
  0x8d   :  { %297 = vmatmul.f32.gmra.mxu2 %v698_v16  ;;  %338 = vmatmul.f32.gmra.mxu3 %v698_v16 }
  0x93   :  { %379 = vmatmul.f32.gmra.mxu0 %v698_v16  ;;  %420 = vmatmul.f32.gmra.mxu1 %v698_v16 }
  0xb0   :  { %v195_v43 = vpop.f32.mrf.mxu0  ;;  %v236_v44 = vpop.f32.mrf.mxu1 }
  0xb1   :  { %v196_v45 = vadd.f32 %v195_v43, %v166_v37  ;;  %v237_v46 = vadd.f32 %v236_v44, %v167_v42 }
  0xb2   :  { %v207_v47 = vpop.f32.mrf.mxu2  ;;  %v248_v48 = vpop.f32.mrf.mxu3 }
  0xb3   :  { %424 = vst [vmem:[#allocation8] sm:$0xff] %v196_v45  ;;  %v208_v49 = vadd.f32 %v207_v47, %v166_v37  ;;  %v249_v50 = vadd.f32 %v248_v48, %v167_v42 }
  0xb4   :  { %425 = vst [vmem:[#allocation8 + $0x8] sm:$0xff] %v237_v46 }
  0xb5   :  { %448 = vst [vmem:[#allocation8 + $0xc0] sm:$0xff] %v208_v49 }
  0xb6   :  { %449 = vst [vmem:[#allocation8 + $0xc8] sm:$0xff] %v249_v50 }
  0xba   :  { %v210_v51 = vpop.f32.mrf.mxu2  ;;  %v251_v52 = vpop.f32.mrf.mxu3 }
  0xbb   :  { %v198_v53 = vpop.f32.mrf.mxu0  ;;  %v211_v54 = vadd.f32 %v210_v51, %v166_v37  ;;  %v239_v55 = vpop.f32.mrf.mxu1  ;;  %v252_v58 = vadd.f32 %v251_v52, %v167_v42 }
  0xbc   :  { %v199_v56 = vadd.f32 %v198_v53, %v166_v37  ;;  %v240_v57 = vadd.f32 %v239_v55, %v167_v42 }
  0xbd   :  { %454 = vst [vmem:[#allocation8 + $0xf0] sm:$0xff] %v211_v54 }
  0xbe   :  { %430 = vst [vmem:[#allocation8 + $0x30] sm:$0xff] %v199_v56 }
  0xbf   :  { %431 = vst [vmem:[#allocation8 + $0x38] sm:$0xff] %v240_v57 }
  0xc0   :  { %455 = vst [vmem:[#allocation8 + $0xf8] sm:$0xff] %v252_v58 }
  0xc4   :  { %v213_v59 = vpop.f32.mrf.mxu2  ;;  %v254_v60 = vpop.f32.mrf.mxu3 }
  0xc5   :  { %v201_v61 = vpop.f32.mrf.mxu0  ;;  %v214_v62 = vadd.f32 %v213_v59, %v166_v37  ;;  %v242_v63 = vpop.f32.mrf.mxu1  ;;  %v255_v2 = vadd.f32 %v254_v60, %v167_v42 }
  0xc6   :  { %v202_v0 = vadd.f32 %v201_v61, %v166_v37  ;;  %v243_v1 = vadd.f32 %v242_v63, %v167_v42 }
  0xc7   :  { %460 = vst [vmem:[#allocation8 + $0x120] sm:$0xff] %v214_v62 }
  0xc8   :  { %436 = vst [vmem:[#allocation8 + $0x60] sm:$0xff] %v202_v0 }
  0xc9   :  { %437 = vst [vmem:[#allocation8 + $0x68] sm:$0xff] %v243_v1 }
  0xca   :  { %461 = vst [vmem:[#allocation8 + $0x128] sm:$0xff] %v255_v2 }
  0xce   :  { %v216_v3 = vpop.f32.mrf.mxu2  ;;  %v257_v4 = vpop.f32.mrf.mxu3 }
  0xcf   :  { %v204_v5 = vpop.f32.mrf.mxu0  ;;  %v217_v6 = vadd.f32 %v216_v3, %v166_v37  ;;  %v245_v7 = vpop.f32.mrf.mxu1  ;;  %v258_v10 = vadd.f32 %v257_v4, %v167_v42 }
  0xd0   :  { %v205_v8 = vadd.f32 %v204_v5, %v166_v37  ;;  %v246_v9 = vadd.f32 %v245_v7, %v167_v42 }
  0xd1   :  { %466 = vst [vmem:[#allocation8 + $0x150] sm:$0xff] %v217_v6 }
  0xd2   :  { %442 = vst [vmem:[#allocation8 + $0x90] sm:$0xff] %v205_v8 }
  0xd3   :  { %443 = vst [vmem:[#allocation8 + $0x98] sm:$0xff] %v246_v9 }
  0xd4   :  { %467 = vst [vmem:[#allocation8 + $0x158] sm:$0xff] %v258_v10 }
  0xd8   :  { %v277_v15 = vpop.f32.mrf.mxu2  ;;  %v318_v16 = vpop.f32.mrf.mxu3 }
  0xd9   :  { %v278_v17 = vadd.f32 %v277_v15, %v730_v11  ;;  %v319_v18 = vadd.f32 %v318_v16, %v732_v12  ;;  %v359_v19 = vpop.f32.mrf.mxu0  ;;  %v400_v20 = vpop.f32.mrf.mxu1 }
  0xda   :  { %v360_v21 = vadd.f32 %v359_v19, %v734_v13  ;;  %v401_v22 = vadd.f32 %v400_v20, %v736_v14 }
  0xdb   :  { %426 = vst [vmem:[#allocation8 + $0x10] sm:$0xff] %v278_v17 }
  0xdc   :  { %427 = vst [vmem:[#allocation8 + $0x18] sm:$0xff] %v319_v18 }
  0xdd   :  { %428 = vst [vmem:[#allocation8 + $0x20] sm:$0xff] %v360_v21 }
  0xde   :  { %429 = vst [vmem:[#allocation8 + $0x28] sm:$0xff] %v401_v22 }
  0xe0   :  { %v280_v23 = vpop.f32.mrf.mxu2  ;;  %v321_v24 = vpop.f32.mrf.mxu3 }
  0xe1   :  { %v281_v25 = vadd.f32 %v280_v23, %v730_v11  ;;  %v322_v26 = vadd.f32 %v321_v24, %v732_v12  ;;  %v362_v27 = vpop.f32.mrf.mxu0  ;;  %v403_v28 = vpop.f32.mrf.mxu1 }
  0xe2   :  { %v363_v29 = vadd.f32 %v362_v27, %v734_v13  ;;  %v404_v30 = vadd.f32 %v403_v28, %v736_v14 }
  0xe3   :  { %432 = vst [vmem:[#allocation8 + $0x40] sm:$0xff] %v281_v25 }
  0xe4   :  { %433 = vst [vmem:[#allocation8 + $0x48] sm:$0xff] %v322_v26 }
  0xe5   :  { %434 = vst [vmem:[#allocation8 + $0x50] sm:$0xff] %v363_v29 }
  0xe6   :  { %435 = vst [vmem:[#allocation8 + $0x58] sm:$0xff] %v404_v30 }
  0xe8   :  { %v283_v31 = vpop.f32.mrf.mxu2  ;;  %v324_v33 = vpop.f32.mrf.mxu3 }
  0xe9   :  { %v284_v34 = vadd.f32 %v283_v31, %v730_v11  ;;  %v325_v35 = vadd.f32 %v324_v33, %v732_v12  ;;  %v365_v36 = vpop.f32.mrf.mxu0  ;;  %v406_v38 = vpop.f32.mrf.mxu1 }
  0xea   :  { %v366_v39 = vadd.f32 %v365_v36, %v734_v13  ;;  %v407_v40 = vadd.f32 %v406_v38, %v736_v14 }
  0xeb   :  { %438 = vst [vmem:[#allocation8 + $0x70] sm:$0xff] %v284_v34 }
  0xec   :  { %439 = vst [vmem:[#allocation8 + $0x78] sm:$0xff] %v325_v35 }
  0xed   :  { %440 = vst [vmem:[#allocation8 + $0x80] sm:$0xff] %v366_v39 }
  0xee   :  { %441 = vst [vmem:[#allocation8 + $0x88] sm:$0xff] %v407_v40 }
  0xf0   :  { %v286_v41 = vpop.f32.mrf.mxu2  ;;  %v327_v32 = vpop.f32.mrf.mxu3 }
  0xf1   :  { %v287_v37 = vadd.f32 %v286_v41, %v730_v11  ;;  %v328_v42 = vadd.f32 %v327_v32, %v732_v12  ;;  %v368_v43 = vpop.f32.mrf.mxu0  ;;  %v409_v44 = vpop.f32.mrf.mxu1 }
  0xf2   :  { %v369_v45 = vadd.f32 %v368_v43, %v734_v13  ;;  %v410_v46 = vadd.f32 %v409_v44, %v736_v14 }
  0xf3   :  { %444 = vst [vmem:[#allocation8 + $0xa0] sm:$0xff] %v287_v37 }
  0xf4   :  { %445 = vst [vmem:[#allocation8 + $0xa8] sm:$0xff] %v328_v42 }
  0xf5   :  { %446 = vst [vmem:[#allocation8 + $0xb0] sm:$0xff] %v369_v45 }
  0xf6   :  { %447 = vst [vmem:[#allocation8 + $0xb8] sm:$0xff] %v410_v46 }
  0xf8   :  { %v289_v47 = vpop.f32.mrf.mxu2  ;;  %v330_v48 = vpop.f32.mrf.mxu3 }
  0xf9   :  { %v290_v49 = vadd.f32 %v289_v47, %v730_v11  ;;  %v331_v50 = vadd.f32 %v330_v48, %v732_v12  ;;  %v371_v51 = vpop.f32.mrf.mxu0  ;;  %v412_v52 = vpop.f32.mrf.mxu1 }
  0xfa   :  { %v372_v53 = vadd.f32 %v371_v51, %v734_v13  ;;  %v413_v54 = vadd.f32 %v412_v52, %v736_v14 }
  0xfb   :  { %450 = vst [vmem:[#allocation8 + $0xd0] sm:$0xff] %v290_v49 }
  0xfc   :  { %451 = vst [vmem:[#allocation8 + $0xd8] sm:$0xff] %v331_v50 }
  0xfd   :  { %452 = vst [vmem:[#allocation8 + $0xe0] sm:$0xff] %v372_v53 }
  0xfe   :  { %453 = vst [vmem:[#allocation8 + $0xe8] sm:$0xff] %v413_v54 }
 0x100   :  { %v292_v55 = vpop.f32.mrf.mxu2  ;;  %v333_v56 = vpop.f32.mrf.mxu3 }
 0x101   :  { %v293_v57 = vadd.f32 %v292_v55, %v730_v11  ;;  %v334_v58 = vadd.f32 %v333_v56, %v732_v12  ;;  %v374_v59 = vpop.f32.mrf.mxu0  ;;  %v415_v60 = vpop.f32.mrf.mxu1 }
 0x102   :  { %v375_v61 = vadd.f32 %v374_v59, %v734_v13  ;;  %v416_v62 = vadd.f32 %v415_v60, %v736_v14 }
 0x103   :  { %456 = vst [vmem:[#allocation8 + $0x100] sm:$0xff] %v293_v57 }
 0x104   :  { %457 = vst [vmem:[#allocation8 + $0x108] sm:$0xff] %v334_v58 }
 0x105   :  { %458 = vst [vmem:[#allocation8 + $0x110] sm:$0xff] %v375_v61 }
 0x106   :  { %459 = vst [vmem:[#allocation8 + $0x118] sm:$0xff] %v416_v62 }
 0x108   :  { %v295_v63 = vpop.f32.mrf.mxu2  ;;  %v336_v0 = vpop.f32.mrf.mxu3 }
 0x109   :  { %v296_v1 = vadd.f32 %v295_v63, %v730_v11  ;;  %v337_v2 = vadd.f32 %v336_v0, %v732_v12  ;;  %v377_v3 = vpop.f32.mrf.mxu0  ;;  %v418_v4 = vpop.f32.mrf.mxu1 }
 0x10a   :  { %v378_v5 = vadd.f32 %v377_v3, %v734_v13  ;;  %v419_v6 = vadd.f32 %v418_v4, %v736_v14 }
 0x10b   :  { %462 = vst [vmem:[#allocation8 + $0x130] sm:$0xff] %v296_v1 }
 0x10c   :  { %463 = vst [vmem:[#allocation8 + $0x138] sm:$0xff] %v337_v2 }
 0x10d   :  { %464 = vst [vmem:[#allocation8 + $0x140] sm:$0xff] %v378_v5 }
 0x10e   :  { %465 = vst [vmem:[#allocation8 + $0x148] sm:$0xff] %v419_v6 }
 0x110   :  { %v298_v7 = vpop.f32.mrf.mxu2  ;;  %v339_v8 = vpop.f32.mrf.mxu3 }
 0x111   :  { %v299_v9 = vadd.f32 %v298_v7, %v730_v11  ;;  %v340_v10 = vadd.f32 %v339_v8, %v732_v12  ;;  %v380_v15 = vpop.f32.mrf.mxu0  ;;  %v421_v16 = vpop.f32.mrf.mxu1 }
 0x112   :  { %v381_v17 = vadd.f32 %v380_v15, %v734_v13  ;;  %v422_v18 = vadd.f32 %v421_v16, %v736_v14 }
 0x113   :  { %468 = vst [vmem:[#allocation8 + $0x160] sm:$0xff] %v299_v9 }
 0x114   :  { %469 = vst [vmem:[#allocation8 + $0x168] sm:$0xff] %v340_v10 }
 0x115   :  { %470 = vst [vmem:[#allocation8 + $0x170] sm:$0xff] %v381_v17 }
 0x116   :  { %471 = vst [vmem:[#allocation8 + $0x178] sm:$0xff] %v422_v18 }
 0x117   :  { %484 = dma.vmem_to_hbm [thread:$0]  %s477_s29, 6144, %s479_s5, [#allocation4], %s635_s20, %s635_s20, %s636_s21  }
 0x118   :  { %632 = dma.done.wait [#allocation4], 6144  }
 0x119   :  { %633 = vsyncadd [#allocation4], 4294961152 }
 0x11a   :  { %489 = vsyncpa [#allocation3], 1 }
 0x11b   :  { %490 = vsyncpa [#allocation6], 1 }
 0x11c   :  { %491 = vsyncpa [#allocation4], 1 }

</bundles_post_ra>
